<compile_context>
chip_gen: v7x
topology: tpu7x:2x2x1
jax: 0.10.0
libtpu: 0.0.40
codegen_flags: <defaults>
</compile_context>

<pallas_src>
import functools

import jax
import jax.numpy as jnp
from jax.experimental import pallas as pl
from jax.experimental.pallas import tpu as pltpu


def _dice_sums_kernel(x_ref, y_ref, o_ref, *, compute_dtype):
    """One (batch, group, spatial-tile) grid step.

    x_ref: (1, C, TH, W) logits in native dtype.
    y_ref: (1, TH, W)    int8/int32 label map.
    o_ref: (1, 3, C, W)  f32 per-(batch, group) lane-partial accumulator:
           row 0 = sum(softmax * onehot), row 1 = sum(softmax), row 2 = sum(onehot),
           reduced over the TH (sublane) axis only.
    """
    h = pl.program_id(2)

    @pl.when(h == 0)
    def _():
        o_ref[...] = jnp.zeros_like(o_ref)

    C = x_ref.shape[1]
    x = x_ref[0].astype(compute_dtype)          # (C, TH, W) -- f32, or bf16 on v6e/v7x
    labels = y_ref[0].astype(jnp.int32)         # (TH, W)

    # Softmax over the class axis (leading, untiled dim => pure elementwise VPU work).
    m = jnp.max(x, axis=0, keepdims=True)       # (1, TH, W)
    e = jnp.exp(x - m)                          # (C, TH, W)  exp -> EUP slot
    z = jnp.sum(e, axis=0)                      # (TH, W)
    zf = z.astype(jnp.float32)
    r = pl.reciprocal(zf, approx=True)          # EUP reciprocal (idle slot) ...
    r = r * (2.0 - zf * r)                      # ... + one Newton step -> ~f32 accurate
    z_inv = r.astype(compute_dtype)             # (TH, W)

    if C <= 16:
        # Per-class scalar compares: no (C,TH,W) int32 iota and no f32 one-hot temporaries.
        tp_rows, sum_rows, cnt_rows = [], [], []
        for c in range(C):
            sm_c = (e[c] * z_inv).astype(jnp.float32)          # (TH, W), f32 accumulation
            match = labels == c                                # (TH, W) bool
            sum_rows.append(jnp.sum(sm_c, axis=0, keepdims=True))
            tp_rows.append(jnp.sum(jnp.where(match, sm_c, 0.0), axis=0, keepdims=True))
            cnt_rows.append(jnp.sum(jnp.where(match, 1.0, 0.0), axis=0, keepdims=True))
        tp_p = jnp.concatenate(tp_rows, axis=0)                # (C, W)
        sum_p = jnp.concatenate(sum_rows, axis=0)              # (C, W)
        cnt_p = jnp.concatenate(cnt_rows, axis=0)              # (C, W)
    else:
        # Vectorized boolean-mask path for larger C (avoids the f32 one-hot multiply).
        class_ids = jax.lax.broadcasted_iota(jnp.int32, (C,) + labels.shape, 0)
        match = class_ids == labels[None]                      # (C, TH, W) bool
        sm = (e * z_inv[None]).astype(jnp.float32)             # (C, TH, W)
        tp_p = jnp.sum(jnp.where(match, sm, 0.0), axis=1)
        sum_p = jnp.sum(sm, axis=1)
        cnt_p = jnp.sum(jnp.where(match, 1.0, 0.0), axis=1)

    o_ref[0, 0] += tp_p
    o_ref[0, 1] += sum_p
    o_ref[0, 2] += cnt_p


def _device_kind():
    try:
        return jax.devices()[0].device_kind.lower()
    except Exception:
        return ""


def _tpu_vmem_and_cores():
    kind = _device_kind()
    vmem = 128 * 1024 * 1024
    try:
        vmem = int(pltpu.get_tpu_info().vmem_capacity_bytes)
    except Exception:
        if "v7" in kind:
            vmem = 64 * 1024 * 1024
    cores = 2 if "v7" in kind else 1
    return vmem, cores, kind


def soft_dice_loss_multiclass(x, y, smooth=1.0, _max_rows=None):
    """x: (B, C, H, W) logits (any float dtype). y: (B, H, W) or (B, 1, H, W) int label map.

    Matches SoftDiceLossMultiClass(apply_nonlin=F.softmax, batch_dice=True,
    do_bg=False, smooth=1.0).forward(x, y) with loss_mask=None.
    """
    B, C, H, W = x.shape
    if y.ndim == 4 and y.shape[1] == 1:
        y = y.reshape(B, H, W)
    # TODO(synk): pre-one-hot / soft ground truth of shape (B, C, H, W) and loss_mask
    # are not supported; only integer label maps (the PyTorch scatter_ path).

    label_dtype = jnp.int8 if C <= 127 else jnp.int32     # 4x less label traffic
    y3 = y.astype(label_dtype)

    vmem_cap, n_cores, kind = _tpu_vmem_and_cores()
    # bf16 elementwise math only where the VPU/EUP has a bf16 path (v6e / v7x); f32 accum.
    use_bf16 = (x.dtype == jnp.bfloat16) and (("v6" in kind) or ("v7" in kind))
    compute_dtype = jnp.bfloat16 if use_bf16 else jnp.float32

    # ---- layout: the logits block is always a pure bitcast view (no pad, no copy) ----
    S = H * W
    if S % 128 == 0:
        H_eff, W_eff = S // 128, 128          # lane-dense repack, free reshape
        x_eff = x.reshape(B, C, H_eff, W_eff)
        y_eff = y3.reshape(B, H_eff, W_eff)
    else:
        H_eff, W_eff = H, W                   # native (H, W) blocking: W is full-extent lane dim
        x_eff = x
        y_eff = y3

    # ---- spatial tile rows from a per-generation VMEM budget (scales with C, W) ----
    vmem_limit = min((vmem_cap * 3) // 4, 100 * 1024 * 1024)   # ~96 MiB on v5e/v6e, ~48 MiB on v7x
    work_budget = vmem_limit // 2
    Wp = pl.cdiv(W_eff, 128) * 128
    in_b = jnp.dtype(x.dtype).itemsize
    cd_b = jnp.dtype(compute_dtype).itemsize
    bytes_per_row = C * Wp * (2 * in_b + 4 * cd_b) + Wp * 32   # dbl-buffered input + live temps
    max_rows = _max_rows if _max_rows is not None else int(work_budget // bytes_per_row)
    max_rows = max(32, min(1024, (int(max_rows) // 32) * 32))  # multiple of 32 (int8/bf16 packing)

    if H_eff <= max_rows:
        TH, n_tiles = H_eff, 1
    else:
        TH = 0
        for cand in range(max_rows, 31, -32):  # prefer a divisor of H_eff -> no leftover rows
            if H_eff % cand == 0:
                TH = cand
                break
        if TH == 0:
            TH = max_rows
        n_tiles = H_eff // TH
    H_main = n_tiles * TH
    H_tail = H_eff - H_main                    # < TH leftover rows, handled in glue (no pad)

    # ---- optional spatial core-split so odd/small B still fills both TCs on v7x ----
    G = 2 if (n_cores >= 2 and (B % n_cores) != 0 and n_tiles % 2 == 0) else 1
    n_h = n_tiles // G

    kernel = functools.partial(_dice_sums_kernel, compute_dtype=compute_dtype)
    # TODO(synk): if profiling shows exposed DMA (f32 logits, small C on v5e), add
    # pipeline_mode=pl.Buffered(3) on the logits BlockSpec.
    partials = pl.pallas_call(
        kernel,
        out_shape=jax.ShapeDtypeStruct((B * G, 3, C, W_eff), jnp.float32),
        grid_spec=pltpu.PrefetchScalarGridSpec(
            num_scalar_prefetch=0,
            grid=(B, G, n_h),
            in_specs=[
                pl.BlockSpec((1, C, TH, W_eff), lambda b, g, h: (b, 0, g * n_h + h, 0)),
                pl.BlockSpec((1, TH, W_eff), lambda b, g, h: (b, g * n_h + h, 0)),
            ],
            out_specs=pl.BlockSpec((1, 3, C, W_eff), lambda b, g, h: (b * G + g, 0, 0, 0)),
        ),
        compiler_params=pltpu.CompilerParams(
            # batch and group axes own distinct output slots -> safe to shard across cores;
            # the spatial axis accumulates into that slot -> must stay "arbitrary".
            dimension_semantics=("parallel", "parallel", "arbitrary"),
            vmem_limit_bytes=int(vmem_limit),
        ),
    )(x_eff, y_eff)

    sums = jnp.sum(partials, axis=(0, 3))      # (3, C): reduce batch/group slots + lane partials
    tp, sum_sm, count = sums[0], sums[1], sums[2]

    if H_tail > 0:
        # Leftover rows that don't fill a full spatial tile: tiny (< TH rows), computed in
        # plain JAX so the big logits tensor is never padded or copied.
        x_t = x_eff[:, :, H_main:, :].astype(jnp.float32)
        y_t = y_eff[:, H_main:, :].astype(jnp.int32)
        sm_t = jax.nn.softmax(x_t, axis=1)
        oh_t = (y_t[:, None] == jnp.arange(C, dtype=jnp.int32)[None, :, None, None]
                ).astype(jnp.float32)
        tp = tp + jnp.sum(sm_t * oh_t, axis=(0, 2, 3))
        sum_sm = sum_sm + jnp.sum(sm_t, axis=(0, 2, 3))
        count = count + jnp.sum(oh_t, axis=(0, 2, 3))

    fp = sum_sm - tp
    fn = count - tp
    dc = (2.0 * tp + smooth) / (2.0 * tp + fp + fn + smooth)
    # do_bg=False with batch_dice=True drops the background class.  Requires C >= 2
    # (C == 1 -> mean of empty slice -> NaN, identical to the PyTorch module).
    dc = dc[1:]
    return -jnp.mean(dc)


def _reference_loss(x, y, smooth=1.0):
    """Pure-JAX reference mirroring the PyTorch module (correctness check)."""
    B, C, H, W = x.shape
    sm = jax.nn.softmax(x.astype(jnp.float32), axis=1)
    onehot = jax.nn.one_hot(y.astype(jnp.int32), C, axis=1, dtype=jnp.float32)
    axes = (0, 2, 3)
    tp = jnp.sum(sm * onehot, axis=axes)
    fp = jnp.sum(sm * (1.0 - onehot), axis=axes)
    fn = jnp.sum((1.0 - sm) * onehot, axis=axes)
    dc = (2.0 * tp + smooth) / (2.0 * tp + fp + fn + smooth)
    return -jnp.mean(dc[1:])


if __name__ == "__main__":
    key = jax.random.PRNGKey(0)
    kx1, ky1, kx2, ky2, kx3, ky3, kx4, ky4 = jax.random.split(key, 8)

    # Test 1: f32 logits, spatial extent divisible by 128 (lane-dense repack path).
    B, C, H, W = 2, 4, 16, 16
    x1 = jax.random.normal(kx1, (B, C, H, W), dtype=jnp.float32)
    y1 = jax.random.randint(ky1, (B, H, W), 0, C, dtype=jnp.int32)
    loss1 = jax.block_until_ready(soft_dice_loss_multiclass(x1, y1, smooth=1.0))
    ref1 = jax.block_until_ready(_reference_loss(x1, y1, smooth=1.0))
    assert jnp.allclose(loss1, ref1, atol=1e-5, rtol=1e-5), (loss1, ref1)

    # Test 2: bf16 logits, spatial extent NOT divisible by 128 (native-layout path, no pad;
    # on v6e/v7x this also exercises the bf16 compute path, hence the looser tolerance).
    B2, C2, H2, W2 = 2, 5, 10, 12
    x2 = jax.random.normal(kx2, (B2, C2, H2, W2), dtype=jnp.float32).astype(jnp.bfloat16)
    y2 = jax.random.randint(ky2, (B2, H2, W2), 0, C2, dtype=jnp.int32)
    loss2 = jax.block_until_ready(soft_dice_loss_multiclass(x2, y2, smooth=1.0))
    ref2 = jax.block_until_ready(_reference_loss(x2.astype(jnp.float32), y2, smooth=1.0))
    assert jnp.allclose(loss2, ref2, atol=2e-3, rtol=2e-3), (loss2, ref2)

    # Test 3: forced spatial tiling + per-tile accumulation (and the v7x group split if
    # the chip has 2 TCs); B=1, labels passed as (B, 1, H, W).
    B3, C3, H3, W3 = 1, 3, 64, 128
    x3 = jax.random.normal(kx3, (B3, C3, H3, W3), dtype=jnp.float32)
    y3 = jax.random.randint(ky3, (B3, 1, H3, W3), 0, C3, dtype=jnp.int32)
    loss3 = jax.block_until_ready(soft_dice_loss_multiclass(x3, y3, smooth=1.0, _max_rows=32))
    ref3 = jax.block_until_ready(_reference_loss(x3, y3.reshape(B3, H3, W3), smooth=1.0))
    assert jnp.allclose(loss3, ref3, atol=1e-5, rtol=1e-5), (loss3, ref3)

    # Test 4: forced spatial tiling with leftover rows -> exercises the tail-in-glue path.
    B4, C4, H4, W4 = 1, 3, 80, 80
    x4 = jax.random.normal(kx4, (B4, C4, H4, W4), dtype=jnp.float32)
    y4 = jax.random.randint(ky4, (B4, H4, W4), 0, C4, dtype=jnp.int32)
    loss4 = jax.block_until_ready(soft_dice_loss_multiclass(x4, y4, smooth=1.0, _max_rows=32))
    ref4 = jax.block_until_ready(_reference_loss(x4, y4, smooth=1.0))
    assert jnp.allclose(loss4, ref4, atol=1e-5, rtol=1e-5), (loss4, ref4)

    print("KERNEL_OK")
</pallas_src>

<mosaic_0001>
module attributes {stable_mosaic.version = 11 : i64} {
  func.func @_dice_sums_kernel(%arg0: i32, %arg1: i32, %arg2: i32, %arg3: memref<1x4x2x128xf32, #tpu.memory_space<vmem>>, %arg4: memref<1x2x128xi8, #tpu.memory_space<vmem>>, %arg5: memref<1x3x4x128xf32, #tpu.memory_space<vmem>>) attributes {dimension_semantics = [#tpu.dimension_semantics<parallel>, #tpu.dimension_semantics<parallel>, #tpu.dimension_semantics<arbitrary>], iteration_bounds = array<i64: 2, 1, 1>, scalar_prefetch = 0 : i64, scratch_operands = 0 : i64, tpu.core_type = #tpu.core_type<tc>, window_params = [{transform_indices = @transform_0, window_bounds = array<i64: 1, 4, 2, 128>}, {transform_indices = @transform_1, window_bounds = array<i64: 1, 2, 128>}, {transform_indices = @transform_2, window_bounds = array<i64: 1, 3, 4, 128>}]} {
    %c0_i32 = arith.constant 0 : i32
    %0 = arith.cmpi eq, %arg2, %c0_i32 : i32
    %1 = arith.extui %0 : i1 to i32
    %c0_i32_0 = arith.constant 0 : i32
    %2 = arith.cmpi ne, %1, %c0_i32_0 : i32
    scf.if %2 {
      %cst_56 = arith.constant 0.000000e+00 : f32
      %104 = vector.broadcast %cst_56 : f32 to vector<1x3x4x128xf32>
      %c0_57 = arith.constant 0 : index
      %c0_58 = arith.constant 0 : index
      %c0_59 = arith.constant 0 : index
      %c0_60 = arith.constant 0 : index
      %105 = vector.load %arg5[%c0_57, %c0_58, %c0_59, %c0_60] : memref<1x3x4x128xf32, #tpu.memory_space<vmem>>, vector<1x3x4x128xf32>
      tpu.vector_store %arg5[%c0_57, %c0_58, %c0_59, %c0_60], %104 {strides = array<i32>} : memref<1x3x4x128xf32, #tpu.memory_space<vmem>>, vector<1x3x4x128xf32>,
    } else {
    }
    %c0 = arith.constant 0 : index
    %c0_1 = arith.constant 0 : index
    %c0_2 = arith.constant 0 : index
    %c0_3 = arith.constant 0 : index
    %3 = vector.load %arg3[%c0, %c0_1, %c0_2, %c0_3] : memref<1x4x2x128xf32, #tpu.memory_space<vmem>>, vector<1x4x2x128xf32>
    %4 = vector.shape_cast %3 : vector<1x4x2x128xf32> to vector<4x2x128xf32>
    %c0_4 = arith.constant 0 : index
    %c0_5 = arith.constant 0 : index
    %c0_6 = arith.constant 0 : index
    %5 = vector.load %arg4[%c0_4, %c0_5, %c0_6] : memref<1x2x128xi8, #tpu.memory_space<vmem>>, vector<1x2x128xi8>
    %6 = vector.shape_cast %5 : vector<1x2x128xi8> to vector<2x128xi8>
    %7 = arith.extsi %6 : vector<2x128xi8> to vector<2x128xi32>
    %cst = arith.constant dense<0xFF800000> : vector<2x128xf32>
    %8 = vector.multi_reduction <maximumf>, %4, %cst [0] : vector<4x2x128xf32> to vector<2x128xf32>
    %9 = vector.shape_cast %8 : vector<2x128xf32> to vector<1x2x128xf32>
    %10 = vector.broadcast %9 : vector<1x2x128xf32> to vector<4x2x128xf32>
    %11 = arith.subf %4, %10 : vector<4x2x128xf32>
    %12 = math.exp %11 : vector<4x2x128xf32>
    %cst_7 = arith.constant dense<0.000000e+00> : vector<2x128xf32>
    %13 = vector.multi_reduction <add>, %12, %cst_7 [0] : vector<4x2x128xf32> to vector<2x128xf32>
    %14 = tpu.reciprocal %13 {approx = true} : vector<2x128xf32> -> vector<2x128xf32>
    %15 = arith.mulf %13, %14 : vector<2x128xf32>
    %cst_8 = arith.constant 2.000000e+00 : f32
    %16 = vector.broadcast %cst_8 : f32 to vector<2x128xf32>
    %17 = arith.subf %16, %15 : vector<2x128xf32>
    %18 = arith.mulf %14, %17 : vector<2x128xf32>
    %19 = vector.extract_strided_slice %12 {offsets = [0, 0, 0], sizes = [1, 2, 128], strides = [1, 1, 1]} : vector<4x2x128xf32> to vector<1x2x128xf32>
    %20 = vector.shape_cast %19 : vector<1x2x128xf32> to vector<2x128xf32>
    %21 = arith.mulf %20, %18 : vector<2x128xf32>
    %c0_i32_9 = arith.constant 0 : i32
    %22 = vector.broadcast %c0_i32_9 : i32 to vector<2x128xi32>
    %23 = arith.cmpi eq, %7, %22 : vector<2x128xi32>
    %cst_10 = arith.constant dense<0.000000e+00> : vector<128xf32>
    %24 = vector.multi_reduction <add>, %21, %cst_10 [0] : vector<2x128xf32> to vector<128xf32>
    %25 = vector.shape_cast %24 : vector<128xf32> to vector<1x128xf32>
    %cst_11 = arith.constant 0.000000e+00 : f32
    %26 = vector.broadcast %cst_11 : f32 to vector<2x128xf32>
    %27 = arith.select %23, %21, %26 : vector<2x128xi1>, vector<2x128xf32>
    %cst_12 = arith.constant dense<0.000000e+00> : vector<128xf32>
    %28 = vector.multi_reduction <add>, %27, %cst_12 [0] : vector<2x128xf32> to vector<128xf32>
    %29 = vector.shape_cast %28 : vector<128xf32> to vector<1x128xf32>
    %cst_13 = arith.constant 1.000000e+00 : f32
    %cst_14 = arith.constant 0.000000e+00 : f32
    %30 = vector.broadcast %cst_13 : f32 to vector<2x128xf32>
    %31 = vector.broadcast %cst_14 : f32 to vector<2x128xf32>
    %32 = arith.select %23, %30, %31 : vector<2x128xi1>, vector<2x128xf32>
    %cst_15 = arith.constant dense<0.000000e+00> : vector<128xf32>
    %33 = vector.multi_reduction <add>, %32, %cst_15 [0] : vector<2x128xf32> to vector<128xf32>
    %34 = vector.shape_cast %33 : vector<128xf32> to vector<1x128xf32>
    %35 = vector.extract_strided_slice %12 {offsets = [1, 0, 0], sizes = [1, 2, 128], strides = [1, 1, 1]} : vector<4x2x128xf32> to vector<1x2x128xf32>
    %36 = vector.shape_cast %35 : vector<1x2x128xf32> to vector<2x128xf32>
    %37 = arith.mulf %36, %18 : vector<2x128xf32>
    %c1_i32 = arith.constant 1 : i32
    %38 = vector.broadcast %c1_i32 : i32 to vector<2x128xi32>
    %39 = arith.cmpi eq, %7, %38 : vector<2x128xi32>
    %cst_16 = arith.constant dense<0.000000e+00> : vector<128xf32>
    %40 = vector.multi_reduction <add>, %37, %cst_16 [0] : vector<2x128xf32> to vector<128xf32>
    %41 = vector.shape_cast %40 : vector<128xf32> to vector<1x128xf32>
    %cst_17 = arith.constant 0.000000e+00 : f32
    %42 = vector.broadcast %cst_17 : f32 to vector<2x128xf32>
    %43 = arith.select %39, %37, %42 : vector<2x128xi1>, vector<2x128xf32>
    %cst_18 = arith.constant dense<0.000000e+00> : vector<128xf32>
    %44 = vector.multi_reduction <add>, %43, %cst_18 [0] : vector<2x128xf32> to vector<128xf32>
    %45 = vector.shape_cast %44 : vector<128xf32> to vector<1x128xf32>
    %cst_19 = arith.constant 1.000000e+00 : f32
    %cst_20 = arith.constant 0.000000e+00 : f32
    %46 = vector.broadcast %cst_19 : f32 to vector<2x128xf32>
    %47 = vector.broadcast %cst_20 : f32 to vector<2x128xf32>
    %48 = arith.select %39, %46, %47 : vector<2x128xi1>, vector<2x128xf32>
    %cst_21 = arith.constant dense<0.000000e+00> : vector<128xf32>
    %49 = vector.multi_reduction <add>, %48, %cst_21 [0] : vector<2x128xf32> to vector<128xf32>
    %50 = vector.shape_cast %49 : vector<128xf32> to vector<1x128xf32>
    %51 = vector.extract_strided_slice %12 {offsets = [2, 0, 0], sizes = [1, 2, 128], strides = [1, 1, 1]} : vector<4x2x128xf32> to vector<1x2x128xf32>
    %52 = vector.shape_cast %51 : vector<1x2x128xf32> to vector<2x128xf32>
    %53 = arith.mulf %52, %18 : vector<2x128xf32>
    %c2_i32 = arith.constant 2 : i32
    %54 = vector.broadcast %c2_i32 : i32 to vector<2x128xi32>
    %55 = arith.cmpi eq, %7, %54 : vector<2x128xi32>
    %cst_22 = arith.constant dense<0.000000e+00> : vector<128xf32>
    %56 = vector.multi_reduction <add>, %53, %cst_22 [0] : vector<2x128xf32> to vector<128xf32>
    %57 = vector.shape_cast %56 : vector<128xf32> to vector<1x128xf32>
    %cst_23 = arith.constant 0.000000e+00 : f32
    %58 = vector.broadcast %cst_23 : f32 to vector<2x128xf32>
    %59 = arith.select %55, %53, %58 : vector<2x128xi1>, vector<2x128xf32>
    %cst_24 = arith.constant dense<0.000000e+00> : vector<128xf32>
    %60 = vector.multi_reduction <add>, %59, %cst_24 [0] : vector<2x128xf32> to vector<128xf32>
    %61 = vector.shape_cast %60 : vector<128xf32> to vector<1x128xf32>
    %cst_25 = arith.constant 1.000000e+00 : f32
    %cst_26 = arith.constant 0.000000e+00 : f32
    %62 = vector.broadcast %cst_25 : f32 to vector<2x128xf32>
    %63 = vector.broadcast %cst_26 : f32 to vector<2x128xf32>
    %64 = arith.select %55, %62, %63 : vector<2x128xi1>, vector<2x128xf32>
    %cst_27 = arith.constant dense<0.000000e+00> : vector<128xf32>
    %65 = vector.multi_reduction <add>, %64, %cst_27 [0] : vector<2x128xf32> to vector<128xf32>
    %66 = vector.shape_cast %65 : vector<128xf32> to vector<1x128xf32>
    %67 = vector.extract_strided_slice %12 {offsets = [3, 0, 0], sizes = [1, 2, 128], strides = [1, 1, 1]} : vector<4x2x128xf32> to vector<1x2x128xf32>
    %68 = vector.shape_cast %67 : vector<1x2x128xf32> to vector<2x128xf32>
    %69 = arith.mulf %68, %18 : vector<2x128xf32>
    %c3_i32 = arith.constant 3 : i32
    %70 = vector.broadcast %c3_i32 : i32 to vector<2x128xi32>
    %71 = arith.cmpi eq, %7, %70 : vector<2x128xi32>
    %cst_28 = arith.constant dense<0.000000e+00> : vector<128xf32>
    %72 = vector.multi_reduction <add>, %69, %cst_28 [0] : vector<2x128xf32> to vector<128xf32>
    %73 = vector.shape_cast %72 : vector<128xf32> to vector<1x128xf32>
    %cst_29 = arith.constant 0.000000e+00 : f32
    %74 = vector.broadcast %cst_29 : f32 to vector<2x128xf32>
    %75 = arith.select %71, %69, %74 : vector<2x128xi1>, vector<2x128xf32>
    %cst_30 = arith.constant dense<0.000000e+00> : vector<128xf32>
    %76 = vector.multi_reduction <add>, %75, %cst_30 [0] : vector<2x128xf32> to vector<128xf32>
    %77 = vector.shape_cast %76 : vector<128xf32> to vector<1x128xf32>
    %cst_31 = arith.constant 1.000000e+00 : f32
    %cst_32 = arith.constant 0.000000e+00 : f32
    %78 = vector.broadcast %cst_31 : f32 to vector<2x128xf32>
    %79 = vector.broadcast %cst_32 : f32 to vector<2x128xf32>
    %80 = arith.select %71, %78, %79 : vector<2x128xi1>, vector<2x128xf32>
    %cst_33 = arith.constant dense<0.000000e+00> : vector<128xf32>
    %81 = vector.multi_reduction <add>, %80, %cst_33 [0] : vector<2x128xf32> to vector<128xf32>
    %82 = vector.shape_cast %81 : vector<128xf32> to vector<1x128xf32>
    %83 = tpu.concatenate %29, %45, %61, %77 in 0 : vector<1x128xf32>, vector<1x128xf32>, vector<1x128xf32>, vector<1x128xf32> -> vector<4x128xf32>
    %84 = tpu.concatenate %25, %41, %57, %73 in 0 : vector<1x128xf32>, vector<1x128xf32>, vector<1x128xf32>, vector<1x128xf32> -> vector<4x128xf32>
    %85 = tpu.concatenate %34, %50, %66, %82 in 0 : vector<1x128xf32>, vector<1x128xf32>, vector<1x128xf32>, vector<1x128xf32> -> vector<4x128xf32>
    %c0_34 = arith.constant 0 : index
    %c0_35 = arith.constant 0 : index
    %c0_36 = arith.constant 0 : index
    %c0_37 = arith.constant 0 : index
    %86 = vector.load %arg5[%c0_34, %c0_35, %c0_36, %c0_37] : memref<1x3x4x128xf32, #tpu.memory_space<vmem>>, vector<1x1x4x128xf32>
    %87 = vector.shape_cast %86 : vector<1x1x4x128xf32> to vector<4x128xf32>
    %88 = arith.addf %87, %83 : vector<4x128xf32>
    %c0_38 = arith.constant 0 : index
    %c0_39 = arith.constant 0 : index
    %c0_40 = arith.constant 0 : index
    %c0_41 = arith.constant 0 : index
    %89 = vector.load %arg5[%c0_38, %c0_39, %c0_40, %c0_41] : memref<1x3x4x128xf32, #tpu.memory_space<vmem>>, vector<1x1x4x128xf32>
    %90 = vector.shape_cast %89 : vector<1x1x4x128xf32> to vector<4x128xf32>
    %91 = vector.shape_cast %88 : vector<4x128xf32> to vector<1x1x4x128xf32>
    tpu.vector_store %arg5[%c0_38, %c0_39, %c0_40, %c0_41], %91 {strides = array<i32>} : memref<1x3x4x128xf32, #tpu.memory_space<vmem>>, vector<1x1x4x128xf32>,
    %c0_42 = arith.constant 0 : index
    %c1 = arith.constant 1 : index
    %c0_43 = arith.constant 0 : index
    %c0_44 = arith.constant 0 : index
    %92 = vector.load %arg5[%c0_42, %c1, %c0_43, %c0_44] : memref<1x3x4x128xf32, #tpu.memory_space<vmem>>, vector<1x1x4x128xf32>
    %93 = vector.shape_cast %92 : vector<1x1x4x128xf32> to vector<4x128xf32>
    %94 = arith.addf %93, %84 : vector<4x128xf32>
    %c0_45 = arith.constant 0 : index
    %c1_46 = arith.constant 1 : index
    %c0_47 = arith.constant 0 : index
    %c0_48 = arith.constant 0 : index
    %95 = vector.load %arg5[%c0_45, %c1_46, %c0_47, %c0_48] : memref<1x3x4x128xf32, #tpu.memory_space<vmem>>, vector<1x1x4x128xf32>
    %96 = vector.shape_cast %95 : vector<1x1x4x128xf32> to vector<4x128xf32>
    %97 = vector.shape_cast %94 : vector<4x128xf32> to vector<1x1x4x128xf32>
    tpu.vector_store %arg5[%c0_45, %c1_46, %c0_47, %c0_48], %97 {strides = array<i32>} : memref<1x3x4x128xf32, #tpu.memory_space<vmem>>, vector<1x1x4x128xf32>,
    %c0_49 = arith.constant 0 : index
    %c2 = arith.constant 2 : index
    %c0_50 = arith.constant 0 : index
    %c0_51 = arith.constant 0 : index
    %98 = vector.load %arg5[%c0_49, %c2, %c0_50, %c0_51] : memref<1x3x4x128xf32, #tpu.memory_space<vmem>>, vector<1x1x4x128xf32>
    %99 = vector.shape_cast %98 : vector<1x1x4x128xf32> to vector<4x128xf32>
    %100 = arith.addf %99, %85 : vector<4x128xf32>
    %c0_52 = arith.constant 0 : index
    %c2_53 = arith.constant 2 : index
    %c0_54 = arith.constant 0 : index
    %c0_55 = arith.constant 0 : index
    %101 = vector.load %arg5[%c0_52, %c2_53, %c0_54, %c0_55] : memref<1x3x4x128xf32, #tpu.memory_space<vmem>>, vector<1x1x4x128xf32>
    %102 = vector.shape_cast %101 : vector<1x1x4x128xf32> to vector<4x128xf32>
    %103 = vector.shape_cast %100 : vector<4x128xf32> to vector<1x1x4x128xf32>
    tpu.vector_store %arg5[%c0_52, %c2_53, %c0_54, %c0_55], %103 {strides = array<i32>} : memref<1x3x4x128xf32, #tpu.memory_space<vmem>>, vector<1x1x4x128xf32>,
    return
  }
  func.func @transform_0(%arg0: i32, %arg1: i32, %arg2: i32) -> (i32, i32, i32, i32) {
    %c1_i32 = arith.constant 1 : i32
    %0 = arith.muli %arg1, %c1_i32 : i32
    %1 = arith.addi %0, %arg2 : i32
    %c0_i32 = arith.constant 0 : i32
    %c0_i32_0 = arith.constant 0 : i32
    %c0_i32_1 = arith.constant 0 : i32
    return %arg0, %c0_i32, %1, %c0_i32_0 : i32, i32, i32, i32
  }
  func.func @transform_1(%arg0: i32, %arg1: i32, %arg2: i32) -> (i32, i32, i32) {
    %c1_i32 = arith.constant 1 : i32
    %0 = arith.muli %arg1, %c1_i32 : i32
    %1 = arith.addi %0, %arg2 : i32
    %c0_i32 = arith.constant 0 : i32
    %c0_i32_0 = arith.constant 0 : i32
    return %arg0, %1, %c0_i32 : i32, i32, i32
  }
  func.func @transform_2(%arg0: i32, %arg1: i32, %arg2: i32) -> (i32, i32, i32, i32) {
    %c1_i32 = arith.constant 1 : i32
    %0 = arith.muli %arg0, %c1_i32 : i32
    %1 = arith.addi %0, %arg1 : i32
    %c0_i32 = arith.constant 0 : i32
    %c0_i32_0 = arith.constant 0 : i32
    %c0_i32_1 = arith.constant 0 : i32
    %c0_i32_2 = arith.constant 0 : i32
    return %1, %c0_i32, %c0_i32_0, %c0_i32_1 : i32, i32, i32, i32
  }
}

</mosaic_0001>

<bundles_post_ra>
// kernel: tpu_custom_call.1
= control target key start
LH: loop header
LB: loop body
LE: loop exit
PB: predicated region body
PF: predicated region fallthrough
CT: control target
= control target key end

     0   :  { %7 = vsyncpa [#allocation3], 0  ;;  %s1077_s0 = inlined_call_operand.hbm [shape: f32[2,4,2,128], index: 0, kind: input, shape index: {}]   ;;  %s1078_s1 = inlined_call_operand.hbm [shape: s8[2,2,128], index: 1, kind: input, shape index: {}]   ;;  %s1079_s2 = inlined_call_operand.hbm [shape: f32[2,3,4,128], index: 2, kind: output, shape index: {}]  }
   0x1   :  { %9 = vsyncpa [#allocation3 + $0x1], 0 }
   0x2   :  { %10 = vsyncpa [#allocation6], 0 }
   0x3   :  { %12 = vsyncpa [#allocation6 + $0x1], 0 }
   0x4   :  { %13 = vsyncpa [#allocation4], 0 }
   0x5   :  { %15 = vsyncpa [#allocation4 + $0x1], 0  ;;  %s796_s9 = smov 0   ;;  %s798_s10 = smov 0  }
   0x6   :  { %s800_s11 = smov 0   ;;  %s802_s12 = smov 0  }
   0x7   :  { %s804_s13 = smov 0   ;;  %s806_s14 = smov 0  }
   0x8 LB: > { %s523_s15 = sadd.s32 4294967295, %s771_s14   ;;  %s524_s16 = sadd.s32 4294967294, %s771_s14   ;;  %s771_s14 = sphi %s806_s14, %s21_s14   ;;  %s767_s13 = sphi %s804_s13, %s1098_s13   ;;  %s763_s12 = sphi %s802_s12, %s1097_s12   ;;  %s759_s11 = sphi %s800_s11, %s1096_s11   ;;  %s755_s10 = sphi %s798_s10, %s1095_s10   ;;  %s751_s9 = sphi %s796_s9, %s1094_s9  }
   0x9   : > { %s40_s17 = sadd.s32 1, %s767_s13  ;;  %s51_s18 = sadd.s32 1, %s759_s11 }
   0xa   : > { %p42_p0 = scmp.ge.s32.totalorder %s40_s17, 2  ;;  %p58_p1 = scmp.ne.s32.totalorder %s759_s11, %s755_s10 }
   0xb   : > { %p59_p2 = scmp.eq.s32.totalorder %s771_s14, 0  ;;  %p64_p3 = scmp.ne.s32.totalorder %s755_s10, %s751_s9 }
   0xc   : > { %s1100_s17 = smov (%p42_p0, %s40_s17), 0  ;;  %p65_p5 = scmp.eq.s32.totalorder %s523_s15, 0 }
   0xd   : > { %p837_p4 = por %p59_p2, %p58_p1  ;;  %s46_s20 = ssub.s32 %s767_s13, %s1100_s17 }
   0xe   : > { %p120_p6 = scmp.eq.s32.totalorder %s523_s15, 1  ;;  %p49_p7 = scmp.eq.s32.totalorder %s46_s20, 0 }
   0xf   : > { %p843_p8 = por %p65_p5, %p64_p3  ;;  %p126_p10 = scmp.eq.s32.totalorder %s524_s16, 1 }
  0x10   : > { %p847_p9 = por %p120_p6, %p58_p1  ;;  %p560_p13 = scmp.lt.s32.totalorder %s771_s14, 2 }
  0x11   : > { %s1083_s21 = scalar_select %p843_p8, 1, 0 }
  0x12   : > { %s1084_s22 = scalar_select %p847_p9, 1, 0 }
  0x13   : > { %s852_s23 = scalar_select %p49_p7, %s759_s11, %s51_s18  }
  0x14   : > { %p854_p11 = por %p126_p10, %p64_p3  ;;  %s861_s25 = sand.u32 1, %s759_s11  }
  0x15   : > { %s527_s26 = sshll.u32 %s861_s25, 3  ;;  %s540_s27 = sshll.u32 %s767_s13, 7 }
  0x16   : > { %s1085_s24 = scalar_select %p854_p11, 1, 0 }
  0x17   : > { %s868_s30 = scalar_lea.hbm %s1077_s0, %s540_s27  ;;  %s150_s3 = scalar_lea.vmem [#allocation2], %s527_s26 }
  0x18   : > { %s159_s4 = sshll.u32 %s150_s3, 4  ;;  %p874_p0 = pnand %p560_p13, %p837_p4  ;;  %s870_s4 = int_to_ptr.vmem [resolvable:$true] %s159_s4 }
  0x19   : > { %s147_s6 = scalar_lea.sflag [#allocation3], %s861_s25  ;;  %s625_s7 = scalar_lea.hbm %s868_s30, 128 }
  0x1a   : > { %p626_p2 = scmp.ne.s32.totalorder %s868_s30, %s625_s7  ;;  %p627_p3 = pneg %p874_p0 }
  0x1b   : > { %s630_s16 = scalar_lea.hbm %s1077_s0, 256  ;;  %p631_p4 = scmp.lt.u32.totalorder %s868_s30, %s1077_s0 }
  0x1c   : > { %p628_p5 = pnand %p627_p3, %p626_p2  ;;  %p632_p7 = scmp.lt.u32.totalorder %s630_s16, %s625_s7 }
  0x1d   : > { %p634_p13 = scmp.lt.u32.totalorder %s625_s7, %s868_s30 }
  0x1e   : > { %p629_p6 = pneg %p628_p5  ;;  %p633_p10 = por %p632_p7, %p631_p4 }
  0x20   : > { %p635_p12 = por %p634_p13, %p633_p10 }
  0x22   : > { %p636_p1 = pnand %p635_p12, %p629_p6 }
  0x24   : > { %639 = shalt.err (!%p636_p1)
}
  0x25   : > { %s640_s20 = scalar_lea.vmem %s870_s4, 128  ;;  %s773_s26 = smov [#allocation2]  }
  0x26   : > { %p641_p2 = scmp.ne.s32.totalorder %s870_s4, %s640_s20  ;;  %s645_s27 = sshll.u32 %s773_s26, 4  ;;  %s646_s27 = int_to_ptr.vmem [resolvable:$false] %s645_s27 }
  0x27   : > { %s647_s28 = scalar_lea.vmem %s646_s27, 256  ;;  %p648_p9 = scmp.lt.s32.totalorder %s870_s4, %s646_s27 }
  0x28   : > { %p643_p5 = pnand %p641_p2, %p627_p3  ;;  %p649_p4 = scmp.lt.s32.totalorder %s647_s28, %s640_s20 }
  0x2a   : > { %p644_p11 = pneg %p643_p5  ;;  %p650_p7 = por %p649_p4, %p648_p9 }
  0x2c   : > { %p651_p10 = pnand %p650_p7, %p644_p11 }
  0x2e   : > { %654 = shalt.err (!%p651_p10)
}
  0x2f   : > { %s774_s29 = smov 32   ;;  %s775_s3 = smov 2  }
  0x30   : > { %552 = dma.hbm_to_vmem [thread:$0]  (!%p874_p0), %s868_s30, 128, %s870_s4, %s147_s6, %s774_s29, %s774_s29, %s775_s3  }
  0x31   : > { %p186_p12 = scmp.lt.s32.totalorder %s771_s14, 3  ;;  %s530_s7 = sshll.u32 %s767_s13, 4 }
  0x32   : > { %p1087_p9 = scmp.ge.s32.totalorder %s771_s14, 1  ;;  %s918_s18 = scalar_lea.hbm %s1078_s1, %s530_s7 }
  0x33   : > { %s172_s19 = scalar_lea.vmem [#allocation5], %s861_s25  ;;  %s170_s30 = scalar_lea.sflag [#allocation6], %s861_s25 }
  0x34   : > { %p911_p11 = pnand %p1087_p9, %p186_p12  ;;  %s181_s20 = sshll.u32 %s172_s19, 4  ;;  %s182_s20 = int_to_ptr.vmem [resolvable:$true] %s181_s20 }
  0x35   : > { %s655_s4 = scalar_lea.hbm %s918_s18, 16  ;;  %s660_s27 = scalar_lea.hbm %s1078_s1, 32 }
  0x36   : > { %s1088_s8 = scalar_select %p911_p11, 1, 0 }
  0x37   : > { %p656_p1 = scmp.ne.s32.totalorder %s918_s18, %s655_s4  ;;  %p661_p2 = scmp.lt.u32.totalorder %s918_s18, %s1078_s1 }
  0x38   : > { %p662_p5 = scmp.lt.u32.totalorder %s660_s27, %s655_s4  ;;  %p664_p7 = scmp.lt.u32.totalorder %s655_s4, %s918_s18 }
  0x39   : > { %p658_p6 = pnand %p656_p1, %p627_p3 }
  0x3a   : > { %p663_p4 = por %p662_p5, %p661_p2 }
  0x3b   : > { %p659_p13 = pneg %p658_p6 }
  0x3c   : > { %p665_p10 = por %p664_p7, %p663_p4 }
  0x3e   : > { %p666_p12 = pnand %p665_p10, %p659_p13 }
  0x40   : > { %669 = shalt.err (!%p666_p12)
}
  0x41   : > { %s670_s25 = scalar_lea.vmem %s182_s20, 16  ;;  %s776_s3 = smov [#allocation5]  }
  0x42   : > { %p671_p9 = scmp.ne.s32.totalorder %s182_s20, %s670_s25  ;;  %s675_s7 = sshll.u32 %s776_s3, 4  ;;  %s676_s7 = int_to_ptr.vmem [resolvable:$false] %s675_s7 }
  0x43   : > { %s677_s15 = scalar_lea.vmem %s676_s7, 32  ;;  %p678_p8 = scmp.lt.s32.totalorder %s182_s20, %s676_s7 }
  0x44   : > { %p673_p1 = pnand %p671_p9, %p627_p3  ;;  %p679_p11 = scmp.lt.s32.totalorder %s677_s15, %s670_s25 }
  0x46   : > { %p674_p6 = pneg %p673_p1  ;;  %p680_p2 = por %p679_p11, %p678_p8 }
  0x48   : > { %p681_p5 = pnand %p680_p2, %p674_p6 }
  0x4a   : > { %684 = shalt.err (!%p681_p5)
}
  0x4b   : > { %555 = dma.hbm_to_vmem [thread:$0]  (!%p874_p0), %s918_s18, 16, %s182_s20, %s170_s30  }
  0x4c   : > { %p1089_p13 = scmp.ne.s32.totalorder %s1088_s8, 0 }
  0x4d   : > { %s944_s16 = sand.u32 (!%p1089_p13), 1, %s755_s10   ;;  %p1090_p3 = scmp.ne.s32.totalorder (!%p1089_p13), %s1083_s21, 0 }
  0x4e   : > { %190 = sbr.rel (%p1089_p13) target bundleno = 175 (0xaf), region = 28  ;;  %s532_s19 = sshll.u32 (!%p1089_p13), %s944_s16, 3 }
  0x4f   : > { %s193_s4 = scalar_lea.sflag (!%p1089_p13), [#allocation3], %s944_s16  ;;  %s196_s6 = scalar_lea.vmem (!%p1089_p13), [#allocation2], %s532_s19 }
  0x55   : > { %738 = dma.done.wait (%p1090_p3), %s193_s4, 128  }
  0x56   : > { %740 = vsyncadd (%p1090_p3), %s193_s4, 4294967168  ;;  %s202_s5 = scalar_lea.sflag [#allocation6], %s944_s16  ;;  %s204_s8 = scalar_lea.vmem [#allocation5], %s944_s16 }
  0x57   : > { %742 = dma.done.wait (%p1090_p3), %s202_s5, 16  }
  0x58   : > { %744 = vsyncadd (%p1090_p3), %s202_s5, 4294967280  ;;  %s541_s18 = smul.u32 12, %s944_s16  ;;  %v777_v0 = vmov 0.0   ;;  %vm245_vm0 = vcmask 1041408   ;;  %v239_v1 = vld [vmem:[%s196_s6] sm:$0x3] }
  0x59   : > { %v240_v2 = vld [vmem:[%s196_s6 + $0x2] sm:$0x3]  ;;  %v241_v3 = vld [vmem:[%s196_s6 + $0x4] sm:$0x3]  ;;  %v242_v4 = vld [vmem:[%s196_s6 + $0x6] sm:$0x3] }
  0x5a   : > { %s959_s20 = scalar_lea.vmem [#allocation7], %s541_s18  ;;  %v243_v5 = vld [vmem:[%s204_s8] sm:$0x1]  ;;  %v246_v6 = vsel %vm245_vm0, %v239_v1, -inf  ;;  %v247_v7 = vsel %vm245_vm0, %v240_v2, -inf  ;;  %v248_v9 = vsel %vm245_vm0, %v241_v3, -inf }
  0x5b   : > { %236 = vst [vmem:[%s959_s20] sm:$0xf] %v777_v0  ;;  %237 = vst [vmem:[%s959_s20 + $0x4] sm:$0xf] %v777_v0  ;;  %v966_v8 = vunpack.c.0.s8 %v243_v5  ;;  %v249_v10 = vsel %vm245_vm0, %v242_v4, -inf  ;;  %v250_v11 = vmax.f32 %v246_v6, %v247_v7  ;;  %vm376_vm5 = vcmask 1040384   ;;  %s542_s21 = smul.u32 192, %s763_s12 }
  0x5c   : > { %238 = vst [vmem:[%s959_s20 + $0x8] sm:$0xf] %v777_v0  ;;  %v251_v12 = vmax.f32 %v248_v9, %v249_v10  ;;  %vm379_vm6 = vcmask 1042432   ;;  %s413_s30 = sshll.u32 %s959_s20, 4  ;;  %s399_s12 = scalar_lea.sflag [#allocation4], %s944_s16  ;;  %s1027_s30 = int_to_ptr.vmem [resolvable:$true] %s413_s30 }
  0x5d   : > { %vm277_vm1 = vcmp.eq.s32.totalorder %v966_v8, 0  ;;  %vm302_vm2 = vcmp.eq.s32.totalorder %v966_v8, 1  ;;  %vm327_vm3 = vcmp.eq.s32.totalorder %v966_v8, 2  ;;  %vm352_vm4 = vcmp.eq.s32.totalorder %v966_v8, 3  ;;  %s1025_s28 = scalar_lea.hbm %s1079_s2, %s542_s21  ;;  %s685_s29 = scalar_lea.vmem %s1027_s30, 192 }
  0x5e   : > { %v252_v13 = vmax.f32 %v250_v11, %v251_v12  ;;  %v293_v14 = vsel %vm277_vm1, 1.0, %v777_v0  ;;  %v318_v15 = vsel %vm302_vm2, 1.0, %v777_v0  ;;  %v343_v16 = vsel %vm327_vm3, 1.0, %v777_v0  ;;  %p686_p8 = scmp.ne.s32.totalorder %s1027_s30, %s685_s29  ;;  %p1091_p0 = scmp.ne.s32.totalorder %s1084_s22, 0 }
  0x5f   : > { %v294_v17 = vsel %vm245_vm0, %v293_v14, 0.0  ;;  %v319_v18 = vsel %vm245_vm0, %v318_v15, 0.0  ;;  %v344_v19 = vsel %vm245_vm0, %v343_v16, 0.0  ;;  %v368_v20 = vsel %vm352_vm4, 1.0, %v777_v0  ;;  %s778_s25 = smov [#allocation7]  }
  0x60   : > { %v253_v21 = vsub.f32 %v239_v1, %v252_v13  ;;  %v254_v22 = vsub.f32 %v240_v2, %v252_v13  ;;  %v255_v23 = vsub.f32 %v241_v3, %v252_v13  ;;  %v256_v24 = vsub.f32 %v242_v4, %v252_v13  ;;  %p687_p11 = pnand %p686_p8, %p1091_p0  ;;  %s689_s3 = sshll.u32 %s778_s25, 4  ;;  %s690_s3 = int_to_ptr.vmem [resolvable:$false] %s689_s3 }
  0x61   : > { %v295_v25 = vrot.slane %v294_v17, 4  ;;  %v320_v26 = vrot.slane %v319_v18, 4  ;;  %v345_v27 = vrot.slane %v344_v19, 4  ;;  %v369_v28 = vsel %vm245_vm0, %v368_v20, 0.0  ;;  %s691_s7 = scalar_lea.vmem %s690_s3, 384  ;;  %p692_p7 = scmp.lt.s32.totalorder %s1027_s30, %s690_s3 }
  0x62   : > { %v257_v29 = vmul.f32 1.442695, %v253_v21  ;;  %v259_v30 = vmul.f32 1.442695, %v254_v22  ;;  %v261_v31 = vmul.f32 1.442695, %v255_v23  ;;  %p688_p4 = pneg %p687_p11  ;;  %p693_p10 = scmp.lt.s32.totalorder %s691_s7, %s685_s29 }
  0x63   : > { %v263_v32 = vmul.f32 1.442695, %v256_v24  ;;  %v296_v33 = vadd.f32 %v295_v25, %v294_v17  ;;  %v321_v34 = vadd.f32 %v320_v26, %v319_v18  ;;  %v346_v35 = vadd.f32 %v345_v27, %v344_v19  ;;  %v535_v57 = vld [vmem:[%s959_s20 + $0x8] sm:$0xf] }
  0x64   : > { %615 = vpow2.f32 %v257_v29  ;;  %v370_v36 = vrot.slane %v369_v28, 4  ;;  %p694_p12 = por %p693_p10, %p692_p7 }
  0x65   : > { %617 = vpow2.f32 %v259_v30  ;;  %v297_v37 = vrot.slane %v296_v33, 2  ;;  %v322_v38 = vrot.slane %v321_v34, 2  ;;  %v347_v39 = vrot.slane %v346_v35, 2 }
  0x66   : > { %619 = vpow2.f32 %v261_v31  ;;  %v371_v40 = vadd.f32 %v370_v36, %v369_v28  ;;  %p695_p9 = pnand %p694_p12, %p688_p4 }
  0x67   : > { %621 = vpow2.f32 %v263_v32  ;;  %v298_v41 = vadd.f32 %v297_v37, %v296_v33  ;;  %v323_v42 = vadd.f32 %v322_v38, %v321_v34  ;;  %v348_v43 = vadd.f32 %v347_v39, %v346_v35 }
  0x68   : > { %v372_v44 = vrot.slane %v371_v40, 2 }
  0x69   : > { %v299_v45 = vrot.slane %v298_v41, 1  ;;  %v324_v46 = vrot.slane %v323_v42, 1  ;;  %v349_v47 = vrot.slane %v348_v43, 1 }
  0x6a   : > { %v373_v48 = vadd.f32 %v372_v44, %v371_v40 }
  0x6b   : > { %v300_v49 = vadd.f32 %v299_v45, %v298_v41  ;;  %v325_v50 = vadd.f32 %v324_v46, %v323_v42  ;;  %v350_v51 = vadd.f32 %v349_v47, %v348_v43 }
  0x6c   : > { %v374_v52 = vrot.slane %v373_v48, 1 }
  0x6d   : > { %v384_v53 = vsel %vm376_vm5, %v300_v49, %v325_v50 }
  0x6e   : > { %v616_v54 = vpop.eup %615  ;;  %v375_v55 = vadd.f32 %v374_v52, %v373_v48  ;;  %v385_v56 = vsel %vm245_vm0, %v384_v53, %v350_v51 }
  0x6f   : > { %v618_v58 = vpop.eup %617  ;;  %v265_v59 = vsel %vm245_vm0, %v616_v54, 0.0 }
  0x70   : > { %v620_v60 = vpop.eup %619  ;;  %v266_v61 = vsel %vm245_vm0, %v618_v58, 0.0  ;;  %v386_v62 = vsel %vm379_vm6, %v385_v56, %v375_v55 }
  0x71   : > { %v622_v63 = vpop.eup %621  ;;  %v267_v0 = vadd.f32 %v266_v61, %v265_v59  ;;  %v268_v1 = vsel %vm245_vm0, %v620_v60, 0.0  ;;  %v396_v2 = vadd.f32 %v535_v57, %v386_v62 }
  0x72   : > { %v270_v3 = vsel %vm245_vm0, %v622_v63, 0.0 }
  0x73   : > { %v269_v4 = vadd.f32 %v268_v1, %v267_v0  ;;  %536 = vst [vmem:[%s959_s20 + $0x8] sm:$0xf] %v396_v2 }
  0x75   : > { %v271_v5 = vadd.f32 %v270_v3, %v269_v4 }
  0x77   : > { %623 = vrcp.f32 %v271_v5 }
  0x81   : > { %v624_v6 = vpop.eup %623 }
  0x82   : > { %v273_v7 = vmul.f32 %v624_v6, %v271_v5 }
  0x84   : > { %v274_v9 = vsub.f32 2.0, %v273_v7  ;;  %v387_v7 = vld [vmem:[%s959_s20] sm:$0xf] }
  0x86   : > { %v275_v10 = vmul.f32 %v624_v6, %v274_v9 }
  0x88   : > { %v276_v11 = vmul.f32 %v616_v54, %v275_v10  ;;  %v301_v12 = vmul.f32 %v618_v58, %v275_v10  ;;  %v326_v13 = vmul.f32 %v620_v60, %v275_v10  ;;  %v351_v14 = vmul.f32 %v622_v63, %v275_v10 }
  0x8a   : > { %v285_v15 = vsel %vm277_vm1, %v276_v11, 0.0  ;;  %v310_v16 = vsel %vm302_vm2, %v301_v12, 0.0  ;;  %v335_v17 = vsel %vm327_vm3, %v326_v13, 0.0  ;;  %v360_v18 = vsel %vm352_vm4, %v351_v14, 0.0 }
  0x8b   : > { %v286_v19 = vsel %vm245_vm0, %v285_v15, 0.0  ;;  %v311_v20 = vsel %vm245_vm0, %v310_v16, 0.0  ;;  %v336_v21 = vsel %vm245_vm0, %v335_v17, 0.0  ;;  %v361_v22 = vsel %vm245_vm0, %v360_v18, 0.0  ;;  %v533_v17 = vld [vmem:[%s959_s20 + $0x4] sm:$0xf] }
  0x8c   : > { %v287_v23 = vrot.slane %v286_v19, 4  ;;  %v312_v24 = vrot.slane %v311_v20, 4  ;;  %v337_v25 = vrot.slane %v336_v21, 4  ;;  %v362_v26 = vrot.slane %v361_v22, 4 }
  0x8d   : > { %v278_v27 = vsel %vm245_vm0, %v276_v11, 0.0  ;;  %v303_v28 = vsel %vm245_vm0, %v301_v12, 0.0  ;;  %v328_v29 = vsel %vm245_vm0, %v326_v13, 0.0  ;;  %v353_v8 = vsel %vm245_vm0, %v351_v14, 0.0 }
  0x8e   : > { %v288_v30 = vadd.f32 %v287_v23, %v286_v19  ;;  %v313_v31 = vadd.f32 %v312_v24, %v311_v20  ;;  %v338_v32 = vadd.f32 %v337_v25, %v336_v21  ;;  %v363_v33 = vadd.f32 %v362_v26, %v361_v22 }
  0x8f   : > { %v279_v34 = vrot.slane %v278_v27, 4  ;;  %v304_v35 = vrot.slane %v303_v28, 4  ;;  %v329_v36 = vrot.slane %v328_v29, 4  ;;  %v354_v37 = vrot.slane %v353_v8, 4 }
  0x90   : > { %v289_v38 = vrot.slane %v288_v30, 2  ;;  %v314_v39 = vrot.slane %v313_v31, 2  ;;  %v339_v40 = vrot.slane %v338_v32, 2  ;;  %v364_v41 = vrot.slane %v363_v33, 2 }
  0x91   : > { %v280_v42 = vadd.f32 %v279_v34, %v278_v27  ;;  %v305_v43 = vadd.f32 %v304_v35, %v303_v28  ;;  %v330_v44 = vadd.f32 %v329_v36, %v328_v29  ;;  %v355_v45 = vadd.f32 %v354_v37, %v353_v8 }
  0x92   : > { %v290_v46 = vadd.f32 %v289_v38, %v288_v30  ;;  %v315_v47 = vadd.f32 %v314_v39, %v313_v31  ;;  %v340_v48 = vadd.f32 %v339_v40, %v338_v32  ;;  %v365_v49 = vadd.f32 %v364_v41, %v363_v33 }
  0x93   : > { %v281_v50 = vrot.slane %v280_v42, 2  ;;  %v306_v51 = vrot.slane %v305_v43, 2  ;;  %v331_v52 = vrot.slane %v330_v44, 2  ;;  %v356_v53 = vrot.slane %v355_v45, 2 }
  0x94   : > { %v291_v54 = vrot.slane %v290_v46, 1  ;;  %v316_v55 = vrot.slane %v315_v47, 1  ;;  %v341_v56 = vrot.slane %v340_v48, 1  ;;  %v366_v57 = vrot.slane %v365_v49, 1 }
  0x95   : > { %v282_v58 = vadd.f32 %v281_v50, %v280_v42  ;;  %v307_v59 = vadd.f32 %v306_v51, %v305_v43  ;;  %v332_v60 = vadd.f32 %v331_v52, %v330_v44  ;;  %v357_v61 = vadd.f32 %v356_v53, %v355_v45 }
  0x96   : > { %v292_v62 = vadd.f32 %v291_v54, %v290_v46  ;;  %v317_v63 = vadd.f32 %v316_v55, %v315_v47  ;;  %v342_v0 = vadd.f32 %v341_v56, %v340_v48  ;;  %v367_v1 = vadd.f32 %v366_v57, %v365_v49 }
  0x97   : > { %v283_v2 = vrot.slane %v282_v58, 1  ;;  %v308_v3 = vrot.slane %v307_v59, 1  ;;  %v333_v4 = vrot.slane %v332_v60, 1  ;;  %v358_v5 = vrot.slane %v357_v61, 1 }
  0x98   : > { %v377_v6 = vsel %vm376_vm5, %v292_v62, %v317_v63 }
  0x99   : > { %v378_v9 = vsel %vm245_vm0, %v377_v6, %v342_v0  ;;  %v284_v10 = vadd.f32 %v283_v2, %v282_v58  ;;  %v309_v11 = vadd.f32 %v308_v3, %v307_v59  ;;  %v334_v12 = vadd.f32 %v333_v4, %v332_v60 }
  0x9a   : > { %v380_v13 = vsel %vm379_vm6, %v378_v9, %v367_v1  ;;  %v359_v14 = vadd.f32 %v358_v5, %v357_v61 }
  0x9b   : > { %v388_v15 = vadd.f32 %v387_v7, %v380_v13  ;;  %v381_v16 = vsel %vm376_vm5, %v284_v10, %v309_v11 }
  0x9c   : > { %v382_v18 = vsel %vm245_vm0, %v381_v16, %v334_v12 }
  0x9d   : > { %389 = vst [vmem:[%s959_s20] sm:$0xf] %v388_v15  ;;  %v383_v19 = vsel %vm379_vm6, %v382_v18, %v359_v14 }
  0x9e   : > { %v392_v20 = vadd.f32 %v533_v17, %v383_v19 }
  0xa0   : > { %534 = vst [vmem:[%s959_s20 + $0x4] sm:$0xf] %v392_v20 }
  0xa1   : > { %698 = shalt.err (!%p695_p9)
}
  0xa2   : > { %s699_s15 = scalar_lea.hbm %s1025_s28, 192  ;;  %s703_s6 = scalar_lea.hbm %s1079_s2, 384 }
  0xa3   : > { %p700_p1 = scmp.ne.s32.totalorder %s1025_s28, %s699_s15  ;;  %p704_p5 = scmp.lt.u32.totalorder %s1025_s28, %s1079_s2 }
  0xa4   : > { %p705_p13 = scmp.lt.u32.totalorder %s703_s6, %s699_s15  ;;  %p707_p8 = scmp.lt.u32.totalorder %s699_s15, %s1025_s28 }
  0xa5   : > { %p701_p6 = pnand %p700_p1, %p1091_p0 }
  0xa6   : > { %p706_p3 = por %p705_p13, %p704_p5 }
  0xa7   : > { %p702_p2 = pneg %p701_p6 }
  0xa8   : > { %p708_p11 = por %p707_p8, %p706_p3 }
  0xaa   : > { %p709_p4 = pnand %p708_p11, %p702_p2 }
  0xac   : > { %712 = shalt.err (!%p709_p4)
}
  0xad   : > { %s779_s18 = smov 64   ;;  %s780_s20 = smov 4  }
  0xae   : > { %547 = dma.vmem_to_hbm [thread:$0]  (%p1091_p0), %s1027_s30, 192, %s1025_s28, %s399_s12, %s779_s18, %s779_s18, %s780_s20  }
  0xaf PF: > { %s428_s21 = sand.u32 1, %s751_s9   ;;  %p1092_p7 = scmp.ne.s32.totalorder %s1085_s24, 0 }
  0xb0   : > { %p1093_p10 = scmp.ge.s32.totalorder %s771_s14, 2  ;;  %s429_s26 = scalar_lea.sflag [#allocation4], %s428_s21 }
  0xb2   : > { %p557_p12 = pnand %p1093_p10, %p1092_p7 }
  0xb4   : > { %746 = dma.done.wait (!%p557_p12), %s429_s26, 192  }
  0xb5   : > { %748 = vsyncadd (!%p557_p12), %s429_s26, 4294967104  ;;  %s21_s14 = sadd.s32 1, %s771_s14   ;;  %s1094_s9 = smov %s755_s10 }
  0xb6   : > { %p18_p9 = scmp.ge.s32.totalorder %s21_s14, 4   ;;  %s1095_s10 = smov %s759_s11 }
  0xb7   : > { %s1096_s11 = smov %s852_s23  ;;  %s1097_s12 = smov %s767_s13 }
  0xb8   : > { %s1098_s13 = smov %s1100_s17  ;;  %20 = sbr.rel (!%p18_p9) target bundleno = 8 (0x8), region = 92 }
  0xbf   :  { %434 = vsyncpa [#allocation3], 1 }
  0xc0   :  { %436 = vsyncpa [#allocation3 + $0x1], 1 }
  0xc1   :  { %437 = vsyncpa [#allocation6], 1 }
  0xc2   :  { %439 = vsyncpa [#allocation6 + $0x1], 1 }
  0xc3   :  { %440 = vsyncpa [#allocation4], 1 }
  0xc4   :  { %442 = vsyncpa [#allocation4 + $0x1], 1 }

</bundles_post_ra>
